<compile_context>
chip_gen: v6e
topology: v6e:2x2x1
jax: 0.10.0
libtpu: 0.0.40
codegen_flags: <defaults>
</compile_context>

<pallas_src>
import jax
import jax.numpy as jnp
from jax.experimental import pallas as pl
from jax.experimental.pallas import tpu as pltpu


_BN_EPS = 1e-5


def _round_up(x, m):
    return (x + m - 1) // m * m


def _cdiv(a, b):
    return -(-a // b)


def _default_n_pad():
    """256-lane blocks on v6e/v7x (256x256 MXU), 128 elsewhere (v5e etc.)."""
    try:
        kind = jax.devices()[0].device_kind.lower()
        if ("v6" in kind) or ("v7" in kind):
            return 256
    except Exception:
        pass
    return 128


def _pick_batch_tile(rows, block_b):
    """Batch tile (in packed rows): multiple of 8, <= block_b, and an even
    number of grid steps (>= 2) when the batch is big enough — keeps the two
    v7x TensorCores balanced under dimension_semantics=('parallel',)."""
    r8 = _round_up(max(rows, 1), 8)
    if r8 < 32:
        return min(r8, _round_up(block_b, 8))
    steps = _cdiv(r8, block_b)
    if steps % 2:
        steps += 1
    steps = max(steps, 2)
    return _round_up(_cdiv(r8, steps), 8)


# --------------------------------------------------------------------------
# Kernel: one batch tile (TB packed rows) through all 8 Linear layers.
#   x_ref      : (TB, pack*input_dim)     compute dtype
#   w1_ref     : (pack*input_dim, N_PAD)  compute dtype (BN folded, block-diag)
#   wstack_ref : (7, N_PAD, N_PAD)        compute dtype (layers 2..8, block-diag)
#   bias_ref   : (8, N_PAD)               f32 (added after f32 accumulation)
#   out_ref    : (TB, N_PAD)              compute dtype
# --------------------------------------------------------------------------
def _mlp_kernel(x_ref, w1_ref, wstack_ref, bias_ref, out_ref):
    w1 = w1_ref[...]
    h = x_ref[...].astype(w1.dtype)

    # Layer 1 (BatchNorm folded into w1 / bias row 0) + ReLU.
    h = jnp.dot(h, w1, preferred_element_type=jnp.float32) + bias_ref[0:1, :]
    h = jnp.maximum(h, 0.0)

    # Layers 2..7: Linear + ReLU (Dropout == identity, double ReLU == ReLU).
    for i in range(6):
        w = wstack_ref[i]
        h = jnp.dot(h.astype(w.dtype), w,
                    preferred_element_type=jnp.float32) + bias_ref[i + 1:i + 2, :]
        h = jnp.maximum(h, 0.0)

    # Final Linear (layers2), no activation.
    w = wstack_ref[6]
    h = jnp.dot(h.astype(w.dtype), w,
                preferred_element_type=jnp.float32) + bias_ref[7:8, :]

    out_ref[...] = h.astype(out_ref.dtype)


# --------------------------------------------------------------------------
# One-time parameter preparation (per model, not per call): fold BN into
# Linear-1, build block-diagonal lane-packed weights, tile biases, cast.
# --------------------------------------------------------------------------
def prepare_fused_params(params, *, compute_dtype=jnp.bfloat16, n_pad=None):
    if n_pad is None:
        n_pad = _default_n_pad()

    gamma = params["bn_gamma"][0]
    beta = params["bn_beta"][0]
    mean = params["bn_mean"][0]
    var = params["bn_var"][0]

    scale = gamma * jax.lax.rsqrt(var + _BN_EPS)      # (input_dim,)
    shift = beta - mean * scale                       # (input_dim,)

    # Fold BN into Linear 1: BN(x)@W1 + b1 == x@(diag(scale)W1) + (shift@W1 + b1)
    w1 = params["w1"] * scale[:, None]
    b1 = params["b1"][0] + shift @ params["w1"]

    ws = [w1] + [params[f"w{i}"] for i in range(2, 9)]
    bs = [b1] + [params[f"b{i}"][0] for i in range(2, 9)]

    input_dim = ws[0].shape[0]
    output_dim = ws[-1].shape[1]
    widths = [input_dim] + [w.shape[1] for w in ws]
    max_w = max(widths)

    # If some width exceeds n_pad, grow n_pad; otherwise pack `pack` copies of
    # every layer block-diagonally so each 128/256-lane pass carries `pack`
    # independent batch rows.
    n_pad = max(n_pad, _round_up(max_w, 128))
    pack = max(1, n_pad // max_w)

    def pack_block_diag(w, rows_total, cols_total):
        d_in, d_out = w.shape
        m = jnp.zeros((rows_total, cols_total), jnp.float32)
        for g in range(pack):
            m = m.at[g * d_in:(g + 1) * d_in, g * d_out:(g + 1) * d_out].set(w)
        return m

    def pack_bias(bvec):
        d = bvec.shape[0]
        v = jnp.zeros((n_pad,), jnp.float32)
        for g in range(pack):
            v = v.at[g * d:(g + 1) * d].set(bvec)
        return v

    w1_p = pack_block_diag(ws[0], pack * input_dim, n_pad).astype(compute_dtype)
    w_stack = jnp.stack(
        [pack_block_diag(ws[i], n_pad, n_pad) for i in range(1, 8)]
    ).astype(compute_dtype)                              # (7, n_pad, n_pad)
    biases = jnp.stack([pack_bias(b) for b in bs]).astype(jnp.float32)  # (8, n_pad)

    return {
        "w1": w1_p, "w_stack": w_stack, "biases": biases,
        "input_dim": input_dim, "output_dim": output_dim,
        "pack": pack, "n_pad": n_pad,
    }


# --------------------------------------------------------------------------
# Wrapper: pack batch rows into lanes, tile over packed rows, unpack output.
# --------------------------------------------------------------------------
def model_simplex_forward(x, fused, *, block_b=512):
    b, in_dim = x.shape
    assert in_dim == fused["input_dim"]
    pack = fused["pack"]
    n_pad = fused["n_pad"]
    out_dim = fused["output_dim"]
    cdt = fused["w1"].dtype

    # Pack `pack` consecutive batch rows side-by-side in lanes.
    b_grp = _round_up(b, pack)
    if b_grp != b:
        x = jnp.zeros((b_grp, in_dim), x.dtype).at[:b].set(x)
    rows = b_grp // pack
    xp = x.reshape(rows, pack * in_dim).astype(cdt)      # bf16 cast halves DMA

    tb = _pick_batch_tile(rows, block_b)
    rows_pad = _round_up(rows, tb)
    if rows_pad != rows:
        xp = jnp.zeros((rows_pad, pack * in_dim), xp.dtype).at[:rows].set(xp)

    grid = (rows_pad // tb,)
    # NOTE: for tb >= ~2048 on v5e, set vmem_limit_bytes in CompilerParams;
    # at the default block_b=512 the working set is far below every limit.
    out = pl.pallas_call(
        _mlp_kernel,
        out_shape=jax.ShapeDtypeStruct((rows_pad, n_pad), cdt),
        grid=grid,
        in_specs=[
            pl.BlockSpec((tb, pack * in_dim), lambda i: (i, 0)),
            # Weights/biases: full-array blocks with constant index_map so they
            # stay resident in VMEM across grid steps (no re-DMA).
            pl.BlockSpec(fused["w1"].shape, lambda i: (0, 0)),
            pl.BlockSpec(fused["w_stack"].shape, lambda i: (0, 0, 0)),
            pl.BlockSpec(fused["biases"].shape, lambda i: (0, 0)),
        ],
        out_specs=pl.BlockSpec((tb, n_pad), lambda i: (i, 0)),
        compiler_params=pltpu.CompilerParams(
            dimension_semantics=("parallel",)),
    )(xp, fused["w1"], fused["w_stack"], fused["biases"])

    # Unpack: lanes [g*out_dim:(g+1)*out_dim] of packed row r hold batch row
    # r*pack + g.
    out = out[:rows, :pack * out_dim].reshape(rows * pack, out_dim)
    return out[:b].astype(jnp.float32)


# --------------------------------------------------------------------------
# Parameter init (shapes match the PyTorch module) + pure-JAX reference.
# --------------------------------------------------------------------------
def init_params(key, input_dim, output_dim, hid_dim, hid_dim2, hid_dim3, hid_dim4):
    dims = [
        (input_dim, hid_dim),    # Linear 1
        (hid_dim, hid_dim),      # Linear 2
        (hid_dim, hid_dim2),     # Linear 3
        (hid_dim2, hid_dim2),    # Linear 4
        (hid_dim2, hid_dim3),    # Linear 5
        (hid_dim3, hid_dim3),    # Linear 6
        (hid_dim3, hid_dim4),    # Linear 7
        (hid_dim4, output_dim),  # layers2 Linear
    ]
    params = {}
    keys = jax.random.split(key, 2 * len(dims) + 4)
    k_iter = iter(keys)

    params["bn_gamma"] = 1.0 + 0.1 * jax.random.normal(next(k_iter), (1, input_dim), jnp.float32)
    params["bn_beta"] = 0.1 * jax.random.normal(next(k_iter), (1, input_dim), jnp.float32)
    params["bn_mean"] = 0.1 * jax.random.normal(next(k_iter), (1, input_dim), jnp.float32)
    params["bn_var"] = 1.0 + 0.1 * jax.random.uniform(next(k_iter), (1, input_dim), jnp.float32)

    for i, (fan_in, fan_out) in enumerate(dims, start=1):
        bound = 1.0 / jnp.sqrt(fan_in)
        params[f"w{i}"] = jax.random.uniform(
            next(k_iter), (fan_in, fan_out), jnp.float32, -bound, bound)
        params[f"b{i}"] = jax.random.uniform(
            next(k_iter), (1, fan_out), jnp.float32, -bound, bound)
    return params


def reference_forward(x, params):
    h = (x - params["bn_mean"]) * jax.lax.rsqrt(params["bn_var"] + _BN_EPS)
    h = h * params["bn_gamma"] + params["bn_beta"]
    for i in range(1, 8):
        h = jnp.maximum(h @ params[f"w{i}"] + params[f"b{i}"], 0.0)
    return h @ params["w8"] + params["b8"]


if __name__ == "__main__":
    batch = 8
    input_dim, output_dim = 16, 4
    hid_dim, hid_dim2, hid_dim3, hid_dim4 = 32, 32, 32, 32

    key = jax.random.PRNGKey(0)
    k_x, k_p = jax.random.split(key)
    x = jax.random.normal(k_x, (batch, input_dim), jnp.float32)
    params = init_params(k_p, input_dim, output_dim,
                         hid_dim, hid_dim2, hid_dim3, hid_dim4)

    # One-time fold/pack/pad.  bf16 compute (MXU throughput, halved DMA /
    # writeback); pass compute_dtype=jnp.float32 for tighter numerics.
    fused = prepare_fused_params(params, compute_dtype=jnp.bfloat16)

    out = model_simplex_forward(x, fused)
    out = jax.block_until_ready(out)

    ref = reference_forward(x, params)
    assert out.shape == (batch, output_dim)
    # bf16 weights/activations -> relaxed tolerance (f32 accumulation inside).
    assert jnp.allclose(out, ref, atol=3e-2, rtol=3e-2), "mismatch vs JAX reference"

    print("KERNEL_OK")
</pallas_src>

<mosaic_0001>
module attributes {stable_mosaic.version = 11 : i64} {
  func.func @_mlp_kernel(%arg0: i32, %arg1: memref<8x64xbf16, #tpu.memory_space<vmem>>, %arg2: memref<64x128xbf16, #tpu.memory_space<vmem>>, %arg3: memref<7x128x128xbf16, #tpu.memory_space<vmem>>, %arg4: memref<8x128xf32, #tpu.memory_space<vmem>>, %arg5: memref<8x128xbf16, #tpu.memory_space<vmem>>) attributes {dimension_semantics = [#tpu.dimension_semantics<parallel>], iteration_bounds = array<i64: 1>, scalar_prefetch = 0 : i64, scratch_operands = 0 : i64, tpu.core_type = #tpu.core_type<tc>, window_params = [{transform_indices = @transform_0, window_bounds = array<i64: 8, 64>}, {pipeline_mode = #tpu.pipeline_mode<synchronous>, transform_indices = @transform_1, window_bounds = array<i64: 64, 128>}, {pipeline_mode = #tpu.pipeline_mode<synchronous>, transform_indices = @transform_2, window_bounds = array<i64: 7, 128, 128>}, {pipeline_mode = #tpu.pipeline_mode<synchronous>, transform_indices = @transform_3, window_bounds = array<i64: 8, 128>}, {transform_indices = @transform_4, window_bounds = array<i64: 8, 128>}]} {
    %c0 = arith.constant 0 : index
    %c0_0 = arith.constant 0 : index
    %0 = vector.load %arg2[%c0, %c0_0] : memref<64x128xbf16, #tpu.memory_space<vmem>>, vector<64x128xbf16>
    %c0_1 = arith.constant 0 : index
    %c0_2 = arith.constant 0 : index
    %1 = vector.load %arg1[%c0_1, %c0_2] : memref<8x64xbf16, #tpu.memory_space<vmem>>, vector<8x64xbf16>
    %cst = arith.constant dense<0.000000e+00> : vector<8x128xf32>
    %2 = tpu.matmul %1, %0, %cst {dimension_numbers = #tpu.dot_dimension_numbers<[1], [0], [0], [1], [0, 0, 1, 1], [], []>} : vector<8x64xbf16>, vector<64x128xbf16>, vector<8x128xf32> -> vector<8x128xf32>
    %c0_3 = arith.constant 0 : index
    %c0_4 = arith.constant 0 : index
    %3 = vector.load %arg4[%c0_3, %c0_4] : memref<8x128xf32, #tpu.memory_space<vmem>>, vector<1x128xf32>
    %4 = vector.broadcast %3 : vector<1x128xf32> to vector<8x128xf32>
    %5 = arith.addf %2, %4 : vector<8x128xf32>
    %cst_5 = arith.constant 0.000000e+00 : f32
    %6 = vector.broadcast %cst_5 : f32 to vector<8x128xf32>
    %7 = arith.maximumf %5, %6 : vector<8x128xf32>
    %c0_6 = arith.constant 0 : index
    %c0_7 = arith.constant 0 : index
    %c0_8 = arith.constant 0 : index
    %8 = vector.load %arg3[%c0_6, %c0_7, %c0_8] : memref<7x128x128xbf16, #tpu.memory_space<vmem>>, vector<1x128x128xbf16>
    %9 = vector.shape_cast %8 : vector<1x128x128xbf16> to vector<128x128xbf16>
    %10 = arith.truncf %7 : vector<8x128xf32> to vector<8x128xbf16>
    %cst_9 = arith.constant dense<0.000000e+00> : vector<8x128xf32>
    %11 = tpu.matmul %10, %9, %cst_9 {dimension_numbers = #tpu.dot_dimension_numbers<[1], [0], [0], [1], [0, 0, 1, 1], [], []>} : vector<8x128xbf16>, vector<128x128xbf16>, vector<8x128xf32> -> vector<8x128xf32>
    %c1 = arith.constant 1 : index
    %c0_10 = arith.constant 0 : index
    %12 = vector.load %arg4[%c1, %c0_10] : memref<8x128xf32, #tpu.memory_space<vmem>>, vector<1x128xf32>
    %13 = vector.broadcast %12 : vector<1x128xf32> to vector<8x128xf32>
    %14 = arith.addf %11, %13 : vector<8x128xf32>
    %cst_11 = arith.constant 0.000000e+00 : f32
    %15 = vector.broadcast %cst_11 : f32 to vector<8x128xf32>
    %16 = arith.maximumf %14, %15 : vector<8x128xf32>
    %c1_12 = arith.constant 1 : index
    %c0_13 = arith.constant 0 : index
    %c0_14 = arith.constant 0 : index
    %17 = vector.load %arg3[%c1_12, %c0_13, %c0_14] : memref<7x128x128xbf16, #tpu.memory_space<vmem>>, vector<1x128x128xbf16>
    %18 = vector.shape_cast %17 : vector<1x128x128xbf16> to vector<128x128xbf16>
    %19 = arith.truncf %16 : vector<8x128xf32> to vector<8x128xbf16>
    %cst_15 = arith.constant dense<0.000000e+00> : vector<8x128xf32>
    %20 = tpu.matmul %19, %18, %cst_15 {dimension_numbers = #tpu.dot_dimension_numbers<[1], [0], [0], [1], [0, 0, 1, 1], [], []>} : vector<8x128xbf16>, vector<128x128xbf16>, vector<8x128xf32> -> vector<8x128xf32>
    %c2 = arith.constant 2 : index
    %c0_16 = arith.constant 0 : index
    %21 = vector.load %arg4[%c2, %c0_16] : memref<8x128xf32, #tpu.memory_space<vmem>>, vector<1x128xf32>
    %22 = vector.broadcast %21 : vector<1x128xf32> to vector<8x128xf32>
    %23 = arith.addf %20, %22 : vector<8x128xf32>
    %cst_17 = arith.constant 0.000000e+00 : f32
    %24 = vector.broadcast %cst_17 : f32 to vector<8x128xf32>
    %25 = arith.maximumf %23, %24 : vector<8x128xf32>
    %c2_18 = arith.constant 2 : index
    %c0_19 = arith.constant 0 : index
    %c0_20 = arith.constant 0 : index
    %26 = vector.load %arg3[%c2_18, %c0_19, %c0_20] : memref<7x128x128xbf16, #tpu.memory_space<vmem>>, vector<1x128x128xbf16>
    %27 = vector.shape_cast %26 : vector<1x128x128xbf16> to vector<128x128xbf16>
    %28 = arith.truncf %25 : vector<8x128xf32> to vector<8x128xbf16>
    %cst_21 = arith.constant dense<0.000000e+00> : vector<8x128xf32>
    %29 = tpu.matmul %28, %27, %cst_21 {dimension_numbers = #tpu.dot_dimension_numbers<[1], [0], [0], [1], [0, 0, 1, 1], [], []>} : vector<8x128xbf16>, vector<128x128xbf16>, vector<8x128xf32> -> vector<8x128xf32>
    %c3 = arith.constant 3 : index
    %c0_22 = arith.constant 0 : index
    %30 = vector.load %arg4[%c3, %c0_22] : memref<8x128xf32, #tpu.memory_space<vmem>>, vector<1x128xf32>
    %31 = vector.broadcast %30 : vector<1x128xf32> to vector<8x128xf32>
    %32 = arith.addf %29, %31 : vector<8x128xf32>
    %cst_23 = arith.constant 0.000000e+00 : f32
    %33 = vector.broadcast %cst_23 : f32 to vector<8x128xf32>
    %34 = arith.maximumf %32, %33 : vector<8x128xf32>
    %c3_24 = arith.constant 3 : index
    %c0_25 = arith.constant 0 : index
    %c0_26 = arith.constant 0 : index
    %35 = vector.load %arg3[%c3_24, %c0_25, %c0_26] : memref<7x128x128xbf16, #tpu.memory_space<vmem>>, vector<1x128x128xbf16>
    %36 = vector.shape_cast %35 : vector<1x128x128xbf16> to vector<128x128xbf16>
    %37 = arith.truncf %34 : vector<8x128xf32> to vector<8x128xbf16>
    %cst_27 = arith.constant dense<0.000000e+00> : vector<8x128xf32>
    %38 = tpu.matmul %37, %36, %cst_27 {dimension_numbers = #tpu.dot_dimension_numbers<[1], [0], [0], [1], [0, 0, 1, 1], [], []>} : vector<8x128xbf16>, vector<128x128xbf16>, vector<8x128xf32> -> vector<8x128xf32>
    %c4 = arith.constant 4 : index
    %c0_28 = arith.constant 0 : index
    %39 = vector.load %arg4[%c4, %c0_28] : memref<8x128xf32, #tpu.memory_space<vmem>>, vector<1x128xf32>
    %40 = vector.broadcast %39 : vector<1x128xf32> to vector<8x128xf32>
    %41 = arith.addf %38, %40 : vector<8x128xf32>
    %cst_29 = arith.constant 0.000000e+00 : f32
    %42 = vector.broadcast %cst_29 : f32 to vector<8x128xf32>
    %43 = arith.maximumf %41, %42 : vector<8x128xf32>
    %c4_30 = arith.constant 4 : index
    %c0_31 = arith.constant 0 : index
    %c0_32 = arith.constant 0 : index
    %44 = vector.load %arg3[%c4_30, %c0_31, %c0_32] : memref<7x128x128xbf16, #tpu.memory_space<vmem>>, vector<1x128x128xbf16>
    %45 = vector.shape_cast %44 : vector<1x128x128xbf16> to vector<128x128xbf16>
    %46 = arith.truncf %43 : vector<8x128xf32> to vector<8x128xbf16>
    %cst_33 = arith.constant dense<0.000000e+00> : vector<8x128xf32>
    %47 = tpu.matmul %46, %45, %cst_33 {dimension_numbers = #tpu.dot_dimension_numbers<[1], [0], [0], [1], [0, 0, 1, 1], [], []>} : vector<8x128xbf16>, vector<128x128xbf16>, vector<8x128xf32> -> vector<8x128xf32>
    %c5 = arith.constant 5 : index
    %c0_34 = arith.constant 0 : index
    %48 = vector.load %arg4[%c5, %c0_34] : memref<8x128xf32, #tpu.memory_space<vmem>>, vector<1x128xf32>
    %49 = vector.broadcast %48 : vector<1x128xf32> to vector<8x128xf32>
    %50 = arith.addf %47, %49 : vector<8x128xf32>
    %cst_35 = arith.constant 0.000000e+00 : f32
    %51 = vector.broadcast %cst_35 : f32 to vector<8x128xf32>
    %52 = arith.maximumf %50, %51 : vector<8x128xf32>
    %c5_36 = arith.constant 5 : index
    %c0_37 = arith.constant 0 : index
    %c0_38 = arith.constant 0 : index
    %53 = vector.load %arg3[%c5_36, %c0_37, %c0_38] : memref<7x128x128xbf16, #tpu.memory_space<vmem>>, vector<1x128x128xbf16>
    %54 = vector.shape_cast %53 : vector<1x128x128xbf16> to vector<128x128xbf16>
    %55 = arith.truncf %52 : vector<8x128xf32> to vector<8x128xbf16>
    %cst_39 = arith.constant dense<0.000000e+00> : vector<8x128xf32>
    %56 = tpu.matmul %55, %54, %cst_39 {dimension_numbers = #tpu.dot_dimension_numbers<[1], [0], [0], [1], [0, 0, 1, 1], [], []>} : vector<8x128xbf16>, vector<128x128xbf16>, vector<8x128xf32> -> vector<8x128xf32>
    %c6 = arith.constant 6 : index
    %c0_40 = arith.constant 0 : index
    %57 = vector.load %arg4[%c6, %c0_40] : memref<8x128xf32, #tpu.memory_space<vmem>>, vector<1x128xf32>
    %58 = vector.broadcast %57 : vector<1x128xf32> to vector<8x128xf32>
    %59 = arith.addf %56, %58 : vector<8x128xf32>
    %cst_41 = arith.constant 0.000000e+00 : f32
    %60 = vector.broadcast %cst_41 : f32 to vector<8x128xf32>
    %61 = arith.maximumf %59, %60 : vector<8x128xf32>
    %c6_42 = arith.constant 6 : index
    %c0_43 = arith.constant 0 : index
    %c0_44 = arith.constant 0 : index
    %62 = vector.load %arg3[%c6_42, %c0_43, %c0_44] : memref<7x128x128xbf16, #tpu.memory_space<vmem>>, vector<1x128x128xbf16>
    %63 = vector.shape_cast %62 : vector<1x128x128xbf16> to vector<128x128xbf16>
    %64 = arith.truncf %61 : vector<8x128xf32> to vector<8x128xbf16>
    %cst_45 = arith.constant dense<0.000000e+00> : vector<8x128xf32>
    %65 = tpu.matmul %64, %63, %cst_45 {dimension_numbers = #tpu.dot_dimension_numbers<[1], [0], [0], [1], [0, 0, 1, 1], [], []>} : vector<8x128xbf16>, vector<128x128xbf16>, vector<8x128xf32> -> vector<8x128xf32>
    %c7 = arith.constant 7 : index
    %c0_46 = arith.constant 0 : index
    %66 = vector.load %arg4[%c7, %c0_46] : memref<8x128xf32, #tpu.memory_space<vmem>>, vector<1x128xf32>
    %67 = vector.broadcast %66 : vector<1x128xf32> to vector<8x128xf32>
    %68 = arith.addf %65, %67 : vector<8x128xf32>
    %69 = arith.truncf %68 : vector<8x128xf32> to vector<8x128xbf16>
    %c0_47 = arith.constant 0 : index
    %c0_48 = arith.constant 0 : index
    %70 = vector.load %arg5[%c0_47, %c0_48] : memref<8x128xbf16, #tpu.memory_space<vmem>>, vector<8x128xbf16>
    tpu.vector_store %arg5[%c0_47, %c0_48], %69 {strides = array<i32>} : memref<8x128xbf16, #tpu.memory_space<vmem>>, vector<8x128xbf16>,
    return
  }
  func.func @transform_0(%arg0: i32) -> (i32, i32) {
    %c0_i32 = arith.constant 0 : i32
    %c0_i32_0 = arith.constant 0 : i32
    return %arg0, %c0_i32 : i32, i32
  }
  func.func @transform_1(%arg0: i32) -> (i32, i32) {
    %c0_i32 = arith.constant 0 : i32
    %c0_i32_0 = arith.constant 0 : i32
    %c0_i32_1 = arith.constant 0 : i32
    return %c0_i32, %c0_i32_0 : i32, i32
  }
  func.func @transform_2(%arg0: i32) -> (i32, i32, i32) {
    %c0_i32 = arith.constant 0 : i32
    %c0_i32_0 = arith.constant 0 : i32
    %c0_i32_1 = arith.constant 0 : i32
    %c0_i32_2 = arith.constant 0 : i32
    return %c0_i32, %c0_i32_0, %c0_i32_1 : i32, i32, i32
  }
  func.func @transform_3(%arg0: i32) -> (i32, i32) {
    %c0_i32 = arith.constant 0 : i32
    %c0_i32_0 = arith.constant 0 : i32
    %c0_i32_1 = arith.constant 0 : i32
    return %c0_i32, %c0_i32_0 : i32, i32
  }
  func.func @transform_4(%arg0: i32) -> (i32, i32) {
    %c0_i32 = arith.constant 0 : i32
    %c0_i32_0 = arith.constant 0 : i32
    return %arg0, %c0_i32 : i32, i32
  }
}

</mosaic_0001>

<bundles_post_ra>
// kernel: tpu_custom_call.1
= control target key start
LH: loop header
LB: loop body
LE: loop exit
PB: predicated region body
PF: predicated region fallthrough
CT: control target
= control target key end

     0   :  { %9 = vsyncpa [#allocation3], 0  ;;  %s1545_s0 = inlined_call_operand.hbm [shape: bf16[8,64], index: 0, kind: input, shape index: {}]   ;;  %s1546_s1 = inlined_call_operand.hbm [shape: bf16[64,128], index: 1, kind: input, shape index: {}]   ;;  %s1547_s2 = inlined_call_operand.hbm [shape: bf16[7,128,128], index: 2, kind: input, shape index: {}]   ;;  %s1548_s3 = inlined_call_operand.hbm [shape: f32[8,128], index: 3, kind: input, shape index: {}]   ;;  %s1549_s4 = inlined_call_operand.hbm [shape: bf16[8,128], index: 4, kind: output, shape index: {}]  }
   0x1   :  { %10 = vsyncpa [#allocation6], 0 }
   0x2   :  { %11 = vsyncpa [#allocation9], 0 }
   0x3   :  { %12 = vsyncpa [#allocation4], 0  ;;  %s1420_s15 = smov [#allocation5]  }
   0x4   :  { %s28_s16 = sshll.u32 %s1420_s15, 4  ;;  %s29_s16 = int_to_ptr.vmem [resolvable:$true] %s28_s16 }
   0x5   :  { %s1320_s17 = scalar_lea.vmem %s29_s16, 512  ;;  %p1325_p1 = scmp.lt.s32.totalorder %s29_s16, %s29_s16 }
   0x6   :  { %p1321_p0 = scmp.ne.s32.totalorder %s29_s16, %s1320_s17  ;;  %p1326_p2 = scmp.lt.s32.totalorder %s1320_s17, %s1320_s17 }
   0x8   :  { %p1327_p3 = por %p1326_p2, %p1325_p1 }
   0xa   :  { %p1328_p4 = pnand %p1327_p3, %p1321_p0 }
   0xc   :  { %1331 = shalt.err (!%p1328_p4)
}
   0xd   :  { %s1421_s18 = smov 64   ;;  %s1422_s19 = smov 4  }
   0xe   :  { %34 = dma.hbm_to_vmem [thread:$0]  %s1546_s1, 512, %s29_s16, [#allocation6], %s1421_s18, %s1421_s18, %s1422_s19  }
   0xf   :  { %s1423_s22 = smov [#allocation2]   ;;  %s1424_s24 = smov [#allocation7]  }
  0x10   :  { %s19_s23 = sshll.u32 %s1423_s22, 4  ;;  %s40_s25 = sshll.u32 %s1424_s24, 4  ;;  %s20_s23 = int_to_ptr.vmem [resolvable:$true] %s19_s23  ;;  %s41_s25 = int_to_ptr.vmem [resolvable:$true] %s40_s25 }
  0x11   :  { %s1340_s26 = scalar_lea.vmem %s20_s23, 64  ;;  %p1345_p6 = scmp.lt.s32.totalorder %s20_s23, %s20_s23 }
  0x12   :  { %p1341_p5 = scmp.ne.s32.totalorder %s20_s23, %s1340_s26  ;;  %p1346_p7 = scmp.lt.s32.totalorder %s1340_s26, %s1340_s26 }
  0x14   :  { %p1347_p8 = por %p1346_p7, %p1345_p6 }
  0x16   :  { %p1348_p9 = pnand %p1347_p8, %p1341_p5 }
  0x18   :  { %1351 = shalt.err (!%p1348_p9)
}
  0x19   :  { %22 = dma.hbm_to_vmem [thread:$0]  %s1545_s0, 64, %s20_s23, [#allocation3]  }
  0x1a   :  { %s1360_s29 = scalar_lea.vmem %s41_s25, 7168  ;;  %p1365_p11 = scmp.lt.s32.totalorder %s41_s25, %s41_s25 }
  0x1b   :  { %p1361_p10 = scmp.ne.s32.totalorder %s41_s25, %s1360_s29  ;;  %p1366_p12 = scmp.lt.s32.totalorder %s1360_s29, %s1360_s29 }
  0x1d   :  { %p1367_p13 = por %p1366_p12, %p1365_p11 }
  0x1f   :  { %p1368_p0 = pnand %p1367_p13, %p1361_p10 }
  0x21   :  { %1371 = shalt.err (!%p1368_p0)
}
  0x22   :  { %46 = dma.hbm_to_vmem [thread:$0]  %s1547_s2, 7168, %s41_s25, [#allocation6], %s1421_s18, %s1421_s18, %s1422_s19  }
  0x23   :  { %s1425_s5 = smov [#allocation8]  }
  0x24   :  { %s53_s6 = sshll.u32 %s1425_s5, 4  ;;  %s54_s6 = int_to_ptr.vmem [resolvable:$true] %s53_s6 }
  0x25   :  { %s1380_s7 = scalar_lea.vmem %s54_s6, 128  ;;  %p1385_p2 = scmp.lt.s32.totalorder %s54_s6, %s54_s6 }
  0x26   :  { %p1381_p1 = scmp.ne.s32.totalorder %s54_s6, %s1380_s7  ;;  %p1386_p3 = scmp.lt.s32.totalorder %s1380_s7, %s1380_s7 }
  0x28   :  { %p1387_p4 = por %p1386_p3, %p1385_p2 }
  0x2a   :  { %p1388_p5 = pnand %p1387_p4, %p1381_p1 }
  0x2c   :  { %1391 = shalt.err (!%p1388_p5)
}
  0x2d   :  { %56 = dma.hbm_to_vmem [thread:$0]  %s1548_s3, 128, %s54_s6, [#allocation9]  }
  0x2e   :  { %1412 = dma.done.wait [#allocation3], 64  }
  0x2f   :  { %1413 = vsyncadd [#allocation3], 4294967232 }
  0x30   :  { %1414 = dma.done.wait [#allocation6], 7680  }
  0x31   :  { %1415 = vsyncadd [#allocation6], 4294959616 }
  0x32   :  { %1416 = dma.done.wait [#allocation9], 128  }
  0x33   :  { %1417 = vsyncadd [#allocation9], 4294967168  ;;  %v1426_v0 = vmov 0.0   ;;  %vm1427_vm0 = vmmov 0   ;;  %v1252_v1 = vld [vmem:[#allocation5 + $0x18] sm:$0xff]   ;;  %v1253_v2 = vld [vmem:[#allocation5 + $0x10] sm:$0xff]  }
  0x34   :  { %1091 = vmatprep.subr.bf16.mxu0 %v1426_v0  ;;  %1099 = vmatprep.mubr.msk.bf16.mxu0 %vm1427_vm0, %v1426_v0  ;;  %v1256_v3 = vld [vmem:[#allocation7 + $0x38] sm:$0xff]   ;;  %v1254_v4 = vld [vmem:[#allocation5 + $0x8] sm:$0xff]   ;;  %v1257_v5 = vld [vmem:[#allocation7 + $0x30] sm:$0xff]   ;;  %vm108_vm1 = vcmask 523264   ;;  %s1428_s2 = smov [#allocation10]  }
  0x35   :  { %1103 = vmatprep.subr.bf16.mxu1 %v1426_v0  ;;  %1119 = vmatprep.mubr.msk.bf16.mxu1 %vm1427_vm0, %v1426_v0  ;;  %v1255_v6 = vld [vmem:[#allocation5] sm:$0xff]   ;;  %v1258_v7 = vld [vmem:[#allocation7 + $0x28] sm:$0xff]   ;;  %v78_v8 = vld [vmem:[#allocation2] sm:$0xf]  ;;  %s943_s3 = sshll.u32 %s1428_s2, 4  ;;  %s944_s3 = int_to_ptr.vmem [resolvable:$true] %s943_s3 }
  0x36   :  { %1092 = vmatpush3.bf16.msra.mxu0 %v1252_v1  ;;  %1104 = vmatpush3.bf16.msra.mxu1 %v1256_v3  ;;  %v1259_v9 = vld [vmem:[#allocation7 + $0x20] sm:$0xff]   ;;  %v1260_v10 = vld [vmem:[#allocation7 + $0x18] sm:$0xff]   ;;  %v1261_v11 = vld [vmem:[#allocation7 + $0x10] sm:$0xff]   ;;  %s1392_s9 = scalar_lea.vmem %s944_s3, 64  ;;  %p1397_p7 = scmp.lt.s32.totalorder %s944_s3, %s944_s3 }
  0x37   :  { %1093 = vmatprep.subr.bf16.mxu0 %v1426_v0  ;;  %1105 = vmatprep.subr.bf16.mxu1 %v1426_v0  ;;  %v1262_v12 = vld [vmem:[#allocation7 + $0x8] sm:$0xff]   ;;  %v1263_v13 = vld [vmem:[#allocation7] sm:$0xff]   ;;  %v1264_v14 = vld [vmem:[#allocation7 + $0x78] sm:$0xff]   ;;  %p1393_p6 = scmp.ne.s32.totalorder %s944_s3, %s1392_s9  ;;  %p1398_p8 = scmp.lt.s32.totalorder %s1392_s9, %s1392_s9 }
  0x38   :  { %v1265_v15 = vld [vmem:[#allocation7 + $0x70] sm:$0xff]   ;;  %v1266_v16 = vld [vmem:[#allocation7 + $0x68] sm:$0xff]   ;;  %v1267_v17 = vld [vmem:[#allocation7 + $0x60] sm:$0xff]  }
  0x39   :  { %v1268_v18 = vld [vmem:[#allocation7 + $0x58] sm:$0xff]   ;;  %v1269_v19 = vld [vmem:[#allocation7 + $0x50] sm:$0xff]   ;;  %v954_v20 = vld [vmem:[#allocation8] ss:$0 sm:$0xff]  ;;  %p1399_p9 = por %p1398_p8, %p1397_p7 }
  0x3a   :  { %1094 = vmatpush3.bf16.msra.mxu0 %v1253_v2  ;;  %1106 = vmatpush3.bf16.msra.mxu1 %v1257_v5  ;;  %v1270_v28 = vld [vmem:[#allocation7 + $0x48] sm:$0xff]   ;;  %v1271_v29 = vld [vmem:[#allocation7 + $0x40] sm:$0xff]   ;;  %v1272_v30 = vld [vmem:[#allocation7 + $0xb8] sm:$0xff]  }
  0x3b   :  { %1095 = vmatprep.subr.bf16.mxu0 %v1426_v0  ;;  %1107 = vmatprep.subr.bf16.mxu1 %v1426_v0  ;;  %v1273_v31 = vld [vmem:[#allocation7 + $0xb0] sm:$0xff]   ;;  %v1274_v32 = vld [vmem:[#allocation7 + $0xa8] sm:$0xff]   ;;  %v1275_v33 = vld [vmem:[#allocation7 + $0xa0] sm:$0xff]   ;;  %p1400_p10 = pnand %p1399_p9, %p1393_p6 }
  0x3c   :  { %v1276_v34 = vld [vmem:[#allocation7 + $0x98] sm:$0xff]   ;;  %v1277_v35 = vld [vmem:[#allocation7 + $0x90] sm:$0xff]   ;;  %v960_v36 = vld [vmem:[#allocation8 + $0x1] ss:$0 sm:$0xff] }
  0x3d   :  { %v1278_v44 = vld [vmem:[#allocation7 + $0x88] sm:$0xff]   ;;  %v1279_v45 = vld [vmem:[#allocation7 + $0x80] sm:$0xff]   ;;  %v1280_v46 = vld [vmem:[#allocation7 + $0xf8] sm:$0xff]  }
  0x3e   :  { %1096 = vmatpush3.bf16.msra.mxu0 %v1254_v4  ;;  %1108 = vmatpush3.bf16.msra.mxu1 %v1258_v7  ;;  %v1281_v47 = vld [vmem:[#allocation7 + $0xf0] sm:$0xff]   ;;  %v1282_v48 = vld [vmem:[#allocation7 + $0xe8] sm:$0xff]   ;;  %v1283_v49 = vld [vmem:[#allocation7 + $0xe0] sm:$0xff]  }
  0x3f   :  { %1097 = vmatprep.subr.bf16.mxu0 %v1426_v0  ;;  %1109 = vmatprep.subr.bf16.mxu1 %v1426_v0  ;;  %v1284_v50 = vld [vmem:[#allocation7 + $0xd8] sm:$0xff]   ;;  %v1285_v51 = vld [vmem:[#allocation7 + $0xd0] sm:$0xff]   ;;  %v969_v52 = vld [vmem:[#allocation8 + $0x2] ss:$0 sm:$0xff] }
  0x40   :  { %v1286_v60 = vld [vmem:[#allocation7 + $0xc8] sm:$0xff]   ;;  %v1287_v61 = vld [vmem:[#allocation7 + $0xc0] sm:$0xff]   ;;  %v1288_v62 = vld [vmem:[#allocation7 + $0x138] sm:$0xff]  }
  0x41   :  { %v1289_v63 = vld [vmem:[#allocation7 + $0x130] sm:$0xff]   ;;  %v1290_v1 = vld [vmem:[#allocation7 + $0x128] sm:$0xff]   ;;  %v1291_v2 = vld [vmem:[#allocation7 + $0x120] sm:$0xff]  }
  0x42   :  { %1098 = vmatpush3.bf16.msra.mxu0 %v1255_v6  ;;  %1110 = vmatpush3.bf16.msra.mxu1 %v1259_v9  ;;  %v1292_v3 = vld [vmem:[#allocation7 + $0x118] sm:$0xff]   ;;  %v1293_v4 = vld [vmem:[#allocation7 + $0x110] sm:$0xff]   ;;  %v978_v5 = vld [vmem:[#allocation8 + $0x3] ss:$0 sm:$0xff] }
  0x43   :  { %1123 = vmatprep.subr.bf16.mxu0 %v1426_v0  ;;  %1111 = vmatprep.subr.bf16.mxu1 %v1426_v0 }
  0x45   :  { %1100 = vmatmul.mubr.msk.bf16.vlgmr.msra.gmra.mxu0 %vm108_vm1, %v78_v8 }
  0x46   :  { %1139 = vmatprep.mubr.msk.bf16.mxu0 %vm1427_vm0, %v1426_v0  ;;  %1112 = vmatpush3.bf16.msra.mxu1 %v1260_v10 }
  0x47   :  { %1113 = vmatprep.subr.bf16.mxu1 %v1426_v0  ;;  %1124 = vmatpush3.bf16.msra.mxu0 %v1264_v14  ;;  %v1295_v14 = vld [vmem:[#allocation7 + $0x100] sm:$0xff]  }
  0x48   :  { %1125 = vmatprep.subr.bf16.mxu0 %v1426_v0 }
  0x4a   :  { %1114 = vmatpush3.bf16.msra.mxu1 %v1261_v11 }
  0x4b   :  { %1115 = vmatprep.subr.bf16.mxu1 %v1426_v0  ;;  %1126 = vmatpush3.bf16.msra.mxu0 %v1265_v15  ;;  %v1296_v15 = vld [vmem:[#allocation7 + $0x178] sm:$0xff]  }
  0x4c   :  { %1127 = vmatprep.subr.bf16.mxu0 %v1426_v0 }
  0x4e   :  { %1116 = vmatpush3.bf16.msra.mxu1 %v1262_v12 }
  0x4f   :  { %1117 = vmatprep.subr.bf16.mxu1 %v1426_v0  ;;  %1128 = vmatpush3.bf16.msra.mxu0 %v1266_v16  ;;  %v1297_v16 = vld [vmem:[#allocation7 + $0x170] sm:$0xff]  }
  0x50   :  { %1129 = vmatprep.subr.bf16.mxu0 %v1426_v0 }
  0x52   :  { %1118 = vmatpush3.bf16.msra.mxu1 %v1263_v13  ;;  %v1294_v13 = vld [vmem:[#allocation7 + $0x108] sm:$0xff]  }
  0x53   :  { %1143 = vmatprep.subr.bf16.mxu1 %v1426_v0  ;;  %1130 = vmatpush3.bf16.msra.mxu0 %v1267_v17  ;;  %v1298_v17 = vld [vmem:[#allocation7 + $0x168] sm:$0xff]  }
  0x54   :  { %1131 = vmatprep.subr.bf16.mxu0 %v1426_v0 }
  0x57   :  { %1132 = vmatpush3.bf16.msra.mxu0 %v1268_v18  ;;  %v1299_v18 = vld [vmem:[#allocation7 + $0x160] sm:$0xff]  }
  0x58   :  { %1133 = vmatprep.subr.bf16.mxu0 %v1426_v0 }
  0x5b   :  { %1134 = vmatpush3.bf16.msra.mxu0 %v1269_v19  ;;  %v1300_v19 = vld [vmem:[#allocation7 + $0x158] sm:$0xff]  }
  0x5c   :  { %1135 = vmatprep.subr.bf16.mxu0 %v1426_v0 }
  0x5f   :  { %1136 = vmatpush3.bf16.msra.mxu0 %v1270_v28 }
  0x60   :  { %1137 = vmatprep.subr.bf16.mxu0 %v1426_v0 }
  0x63   :  { %1138 = vmatpush3.bf16.msra.mxu0 %v1271_v29  ;;  %v1302_v29 = vld [vmem:[#allocation7 + $0x148] sm:$0xff]  }
  0x64   :  { %1163 = vmatprep.subr.bf16.mxu0 %v1426_v0 }
 0x105   :  { %v146_v21 = vpop.f32.mrf.mxu0 }
 0x106   :  { %v147_v22 = vadd.f32 %v954_v20, %v146_v21  ;;  %v1301_v20 = vld [vmem:[#allocation7 + $0x150] sm:$0xff]   ;;  %v987_v21 = vld [vmem:[#allocation8 + $0x4] ss:$0 sm:$0xff] }
 0x107   :  { %v1101_v23 = vpop.f32.mrf.mxu0 }
 0x108   :  { %v152_v24 = vmax.f32 %v147_v22, 0.0 }
 0x109   :  { %v149_v25 = vpop.f32.mrf.mxu0 }
 0x10a   :  { %v169_v26 = vpack.c.bf16 %v152_v24, %v152_v24 }
 0x10b   :  { %v1102_v27 = vpop.f32.mrf.mxu0 }
 0x10c   :  { %1120 = vmatmul.mubr.bf16.vlgmr.msra.gmra.mxu1 %v169_v26 }
 0x10d   :  { %1159 = vmatprep.mubr.msk.bf16.mxu1 %vm1427_vm0, %v1426_v0  ;;  %1144 = vmatpush3.bf16.msra.mxu1 %v1272_v30  ;;  %v1303_v30 = vld [vmem:[#allocation7 + $0x140] sm:$0xff]  }
 0x10e   :  { %1145 = vmatprep.subr.bf16.mxu1 %v1426_v0 }
 0x111   :  { %1146 = vmatpush3.bf16.msra.mxu1 %v1273_v31  ;;  %v1304_v31 = vld [vmem:[#allocation7 + $0x1b8] sm:$0xff]  }
 0x112   :  { %1147 = vmatprep.subr.bf16.mxu1 %v1426_v0 }
 0x115   :  { %1148 = vmatpush3.bf16.msra.mxu1 %v1274_v32  ;;  %v1305_v32 = vld [vmem:[#allocation7 + $0x1b0] sm:$0xff]  }
 0x116   :  { %1149 = vmatprep.subr.bf16.mxu1 %v1426_v0 }
 0x119   :  { %1150 = vmatpush3.bf16.msra.mxu1 %v1275_v33  ;;  %v1306_v33 = vld [vmem:[#allocation7 + $0x1a8] sm:$0xff]  }
 0x11a   :  { %1151 = vmatprep.subr.bf16.mxu1 %v1426_v0 }
 0x11d   :  { %1152 = vmatpush3.bf16.msra.mxu1 %v1276_v34  ;;  %v1307_v34 = vld [vmem:[#allocation7 + $0x1a0] sm:$0xff]  }
 0x11e   :  { %1153 = vmatprep.subr.bf16.mxu1 %v1426_v0 }
 0x121   :  { %1154 = vmatpush3.bf16.msra.mxu1 %v1277_v35  ;;  %v1308_v35 = vld [vmem:[#allocation7 + $0x198] sm:$0xff]  }
 0x122   :  { %1155 = vmatprep.subr.bf16.mxu1 %v1426_v0 }
 0x125   :  { %1156 = vmatpush3.bf16.msra.mxu1 %v1278_v44 }
 0x126   :  { %1157 = vmatprep.subr.bf16.mxu1 %v1426_v0 }
 0x129   :  { %1158 = vmatpush3.bf16.msra.mxu1 %v1279_v45  ;;  %v1310_v45 = vld [vmem:[#allocation7 + $0x188] sm:$0xff]  }
 0x12a   :  { %1183 = vmatprep.subr.bf16.mxu1 %v1426_v0 }
 0x1cc   :  { %v257_v37 = vpop.f32.mrf.mxu1 }
 0x1cd   :  { %v258_v38 = vadd.f32 %v960_v36, %v257_v37  ;;  %v1309_v36 = vld [vmem:[#allocation7 + $0x190] sm:$0xff]   ;;  %v996_v37 = vld [vmem:[#allocation8 + $0x5] ss:$0 sm:$0xff] }
 0x1ce   :  { %v1121_v39 = vpop.f32.mrf.mxu1 }
 0x1cf   :  { %v263_v40 = vmax.f32 %v258_v38, 0.0 }
 0x1d0   :  { %v260_v41 = vpop.f32.mrf.mxu1 }
 0x1d1   :  { %v281_v42 = vpack.c.bf16 %v263_v40, %v263_v40 }
 0x1d2   :  { %v1122_v43 = vpop.f32.mrf.mxu1 }
 0x1d3   :  { %1140 = vmatmul.mubr.bf16.vlgmr.msra.gmra.mxu0 %v281_v42 }
 0x1d4   :  { %1179 = vmatprep.mubr.msk.bf16.mxu0 %vm1427_vm0, %v1426_v0  ;;  %1164 = vmatpush3.bf16.msra.mxu0 %v1280_v46  ;;  %v1311_v46 = vld [vmem:[#allocation7 + $0x180] sm:$0xff]  }
 0x1d5   :  { %1165 = vmatprep.subr.bf16.mxu0 %v1426_v0 }
 0x1d8   :  { %1166 = vmatpush3.bf16.msra.mxu0 %v1281_v47  ;;  %v1005_v47 = vld [vmem:[#allocation8 + $0x6] ss:$0 sm:$0xff] }
 0x1d9   :  { %1167 = vmatprep.subr.bf16.mxu0 %v1426_v0 }
 0x1dc   :  { %1168 = vmatpush3.bf16.msra.mxu0 %v1282_v48 }
 0x1dd   :  { %1169 = vmatprep.subr.bf16.mxu0 %v1426_v0 }
 0x1e0   :  { %1170 = vmatpush3.bf16.msra.mxu0 %v1283_v49 }
 0x1e1   :  { %1171 = vmatprep.subr.bf16.mxu0 %v1426_v0 }
 0x1e4   :  { %1172 = vmatpush3.bf16.msra.mxu0 %v1284_v50 }
 0x1e5   :  { %1173 = vmatprep.subr.bf16.mxu0 %v1426_v0 }
 0x1e8   :  { %1174 = vmatpush3.bf16.msra.mxu0 %v1285_v51 }
 0x1e9   :  { %1175 = vmatprep.subr.bf16.mxu0 %v1426_v0 }
 0x1ec   :  { %1176 = vmatpush3.bf16.msra.mxu0 %v1286_v60 }
 0x1ed   :  { %1177 = vmatprep.subr.bf16.mxu0 %v1426_v0 }
 0x1f0   :  { %1178 = vmatpush3.bf16.msra.mxu0 %v1287_v61 }
 0x1f1   :  { %1203 = vmatprep.subr.bf16.mxu0 %v1426_v0 }
 0x293   :  { %v369_v53 = vpop.f32.mrf.mxu0 }
 0x294   :  { %v370_v54 = vadd.f32 %v969_v52, %v369_v53 }
 0x295   :  { %v1141_v55 = vpop.f32.mrf.mxu0 }
 0x296   :  { %v375_v56 = vmax.f32 %v370_v54, 0.0  ;;  %v1014_v55 = vld [vmem:[#allocation8 + $0x7] ss:$0 sm:$0xff] }
 0x297   :  { %v372_v57 = vpop.f32.mrf.mxu0 }
 0x298   :  { %v393_v58 = vpack.c.bf16 %v375_v56, %v375_v56 }
 0x299   :  { %v1142_v59 = vpop.f32.mrf.mxu0 }
 0x29a   :  { %1160 = vmatmul.mubr.bf16.vlgmr.msra.gmra.mxu1 %v393_v58 }
 0x29b   :  { %1199 = vmatprep.mubr.msk.bf16.mxu1 %vm1427_vm0, %v1426_v0  ;;  %1184 = vmatpush3.bf16.msra.mxu1 %v1288_v62 }
 0x29c   :  { %1185 = vmatprep.subr.bf16.mxu1 %v1426_v0 }
 0x29f   :  { %1186 = vmatpush3.bf16.msra.mxu1 %v1289_v63 }
 0x2a0   :  { %1187 = vmatprep.subr.bf16.mxu1 %v1426_v0 }
 0x2a3   :  { %1188 = vmatpush3.bf16.msra.mxu1 %v1290_v1 }
 0x2a4   :  { %1189 = vmatprep.subr.bf16.mxu1 %v1426_v0 }
 0x2a7   :  { %1190 = vmatpush3.bf16.msra.mxu1 %v1291_v2 }
 0x2a8   :  { %1191 = vmatprep.subr.bf16.mxu1 %v1426_v0 }
 0x2ab   :  { %1192 = vmatpush3.bf16.msra.mxu1 %v1292_v3 }
 0x2ac   :  { %1193 = vmatprep.subr.bf16.mxu1 %v1426_v0 }
 0x2af   :  { %1194 = vmatpush3.bf16.msra.mxu1 %v1293_v4 }
 0x2b0   :  { %1195 = vmatprep.subr.bf16.mxu1 %v1426_v0 }
 0x2b3   :  { %1196 = vmatpush3.bf16.msra.mxu1 %v1294_v13 }
 0x2b4   :  { %1197 = vmatprep.subr.bf16.mxu1 %v1426_v0 }
 0x2b7   :  { %1198 = vmatpush3.bf16.msra.mxu1 %v1295_v14 }
 0x2b8   :  { %1223 = vmatprep.subr.bf16.mxu1 %v1426_v0 }
 0x35a   :  { %v481_v6 = vpop.f32.mrf.mxu1 }
 0x35b   :  { %v482_v7 = vadd.f32 %v978_v5, %v481_v6 }
 0x35c   :  { %v1161_v8 = vpop.f32.mrf.mxu1 }
 0x35d   :  { %v487_v9 = vmax.f32 %v482_v7, 0.0 }
 0x35e   :  { %v484_v10 = vpop.f32.mrf.mxu1 }
 0x35f   :  { %v505_v11 = vpack.c.bf16 %v487_v9, %v487_v9 }
 0x360   :  { %v1162_v12 = vpop.f32.mrf.mxu1 }
 0x361   :  { %1180 = vmatmul.mubr.bf16.vlgmr.msra.gmra.mxu0 %v505_v11 }
 0x362   :  { %1219 = vmatprep.mubr.msk.bf16.mxu0 %vm1427_vm0, %v1426_v0  ;;  %1204 = vmatpush3.bf16.msra.mxu0 %v1296_v15 }
 0x363   :  { %1205 = vmatprep.subr.bf16.mxu0 %v1426_v0 }
 0x366   :  { %1206 = vmatpush3.bf16.msra.mxu0 %v1297_v16 }
 0x367   :  { %1207 = vmatprep.subr.bf16.mxu0 %v1426_v0 }
 0x36a   :  { %1208 = vmatpush3.bf16.msra.mxu0 %v1298_v17 }
 0x36b   :  { %1209 = vmatprep.subr.bf16.mxu0 %v1426_v0 }
 0x36e   :  { %1210 = vmatpush3.bf16.msra.mxu0 %v1299_v18 }
 0x36f   :  { %1211 = vmatprep.subr.bf16.mxu0 %v1426_v0 }
 0x372   :  { %1212 = vmatpush3.bf16.msra.mxu0 %v1300_v19 }
 0x373   :  { %1213 = vmatprep.subr.bf16.mxu0 %v1426_v0 }
 0x376   :  { %1214 = vmatpush3.bf16.msra.mxu0 %v1301_v20 }
 0x377   :  { %1215 = vmatprep.subr.bf16.mxu0 %v1426_v0 }
 0x37a   :  { %1216 = vmatpush3.bf16.msra.mxu0 %v1302_v29 }
 0x37b   :  { %1217 = vmatprep.subr.bf16.mxu0 %v1426_v0 }
 0x37e   :  { %1218 = vmatpush3.bf16.msra.mxu0 %v1303_v30 }
 0x421   :  { %v593_v22 = vpop.f32.mrf.mxu0 }
 0x422   :  { %v594_v23 = vadd.f32 %v987_v21, %v593_v22 }
 0x423   :  { %v1181_v24 = vpop.f32.mrf.mxu0 }
 0x424   :  { %v599_v25 = vmax.f32 %v594_v23, 0.0 }
 0x425   :  { %v596_v26 = vpop.f32.mrf.mxu0 }
 0x426   :  { %v617_v27 = vpack.c.bf16 %v599_v25, %v599_v25 }
 0x427   :  { %v1182_v28 = vpop.f32.mrf.mxu0 }
 0x428   :  { %1200 = vmatmul.mubr.bf16.vlgmr.msra.gmra.mxu1 %v617_v27 }
 0x429   :  { %1239 = vmatprep.mubr.msk.bf16.mxu1 %vm1427_vm0, %v1426_v0  ;;  %1224 = vmatpush3.bf16.msra.mxu1 %v1304_v31 }
 0x42a   :  { %1225 = vmatprep.subr.bf16.mxu1 %v1426_v0 }
 0x42d   :  { %1226 = vmatpush3.bf16.msra.mxu1 %v1305_v32 }
 0x42e   :  { %1227 = vmatprep.subr.bf16.mxu1 %v1426_v0 }
 0x431   :  { %1228 = vmatpush3.bf16.msra.mxu1 %v1306_v33 }
 0x432   :  { %1229 = vmatprep.subr.bf16.mxu1 %v1426_v0 }
 0x435   :  { %1230 = vmatpush3.bf16.msra.mxu1 %v1307_v34 }
 0x436   :  { %1231 = vmatprep.subr.bf16.mxu1 %v1426_v0 }
 0x439   :  { %1232 = vmatpush3.bf16.msra.mxu1 %v1308_v35 }
 0x43a   :  { %1233 = vmatprep.subr.bf16.mxu1 %v1426_v0 }
 0x43d   :  { %1234 = vmatpush3.bf16.msra.mxu1 %v1309_v36 }
 0x43e   :  { %1235 = vmatprep.subr.bf16.mxu1 %v1426_v0 }
 0x441   :  { %1236 = vmatpush3.bf16.msra.mxu1 %v1310_v45 }
 0x442   :  { %1237 = vmatprep.subr.bf16.mxu1 %v1426_v0 }
 0x445   :  { %1238 = vmatpush3.bf16.msra.mxu1 %v1311_v46 }
 0x4e8   :  { %v705_v38 = vpop.f32.mrf.mxu1 }
 0x4e9   :  { %v706_v39 = vadd.f32 %v996_v37, %v705_v38 }
 0x4ea   :  { %v1201_v40 = vpop.f32.mrf.mxu1 }
 0x4eb   :  { %v711_v41 = vmax.f32 %v706_v39, 0.0 }
 0x4ec   :  { %v708_v42 = vpop.f32.mrf.mxu1 }
 0x4ed   :  { %v729_v43 = vpack.c.bf16 %v711_v41, %v711_v41 }
 0x4ee   :  { %v1202_v44 = vpop.f32.mrf.mxu1 }
 0x4ef   :  { %1220 = vmatmul.mubr.bf16.vlgmr.msra.gmra.mxu0 %v729_v43 }
 0x5af   :  { %v817_v48 = vpop.f32.mrf.mxu0 }
 0x5b0   :  { %v818_v49 = vadd.f32 %v1005_v47, %v817_v48 }
 0x5b1   :  { %v1221_v50 = vpop.f32.mrf.mxu0 }
 0x5b2   :  { %v823_v51 = vmax.f32 %v818_v49, 0.0 }
 0x5b3   :  { %v820_v52 = vpop.f32.mrf.mxu0 }
 0x5b4   :  { %v841_v53 = vpack.c.bf16 %v823_v51, %v823_v51 }
 0x5b5   :  { %v1222_v54 = vpop.f32.mrf.mxu0 }
 0x5b6   :  { %1240 = vmatmul.mubr.bf16.vlgmr.msra.gmra.mxu1 %v841_v53 }
 0x676   :  { %v929_v56 = vpop.f32.mrf.mxu1 }
 0x677   :  { %v930_v57 = vadd.f32 %v1014_v55, %v929_v56 }
 0x678   :  { %v1241_v58 = vpop.f32.mrf.mxu1 }
 0x679   :  { %v935_v59 = vpack.c.bf16 %v930_v57, %v930_v57 }
 0x67a   :  { %v932_v0 = vpop.f32.mrf.mxu1 }
 0x67b   :  { %936 = vst [vmem:[#allocation10] sm:$0xf] %v935_v59 }
 0x67c   :  { %v1242_v60 = vpop.f32.mrf.mxu1 }
 0x67d   :  { %1403 = shalt.err (!%p1400_p10)
}
 0x67e   :  { %946 = dma.vmem_to_hbm [thread:$0]  %s944_s3, 64, %s1549_s4, [#allocation4]  }
 0x67f   :  { %1418 = dma.done.wait [#allocation4], 64  }
 0x680   :  { %1419 = vsyncadd [#allocation4], 4294967232 }
 0x681   :  { %950 = vsyncpa [#allocation3], 1 }
 0x682   :  { %951 = vsyncpa [#allocation6], 1 }
 0x683   :  { %952 = vsyncpa [#allocation9], 1 }
 0x684   :  { %953 = vsyncpa [#allocation4], 1 }

</bundles_post_ra>
